<compile_context>
chip_gen: v7x
topology: tpu7x:2x2x1
jax: 0.10.0
libtpu: 0.0.40
codegen_flags: <defaults>
</compile_context>

<pallas_src>
import jax
import jax.numpy as jnp
from jax.experimental import pallas as pl
from jax.experimental.pallas import tpu as pltpu


def biattention_kernel(v_ref, q_ref, mbias_ref,
                       wv_ref, bv_ref, wq_ref, bq_ref,
                       hw_ref, hb_ref,
                       atten_ref, logits_ref):
    # v_ref:      (BB, Nv, Dv)     q_ref:     (BB, Nq, Dq)
    # mbias_ref:  (BB, 1, Nv*Nq)   lane-dense additive mask (0 or -inf)
    # wv_ref:     (Dv, M)          bv_ref:    (1, M)
    # wq_ref:     (Dq, M)          bq_ref:    (1, M)
    # hw_ref:     (G, M)           hb_ref:    (G,) in SMEM
    # atten_ref / logits_ref: (BB, G, Nv*Nq)
    BB, Nv, Dv = v_ref.shape
    _, Nq, Dq = q_ref.shape
    G, M = hw_ref.shape
    L = Nv * Nq

    # FCNet (weight_norm Linear + ReLU) over all BB batch rows at once:
    # one big MXU matmul per projection, f32 accumulation.
    v2d = v_ref[...].reshape(BB * Nv, Dv)
    q2d = q_ref[...].reshape(BB * Nq, Dq)
    v_proj = jnp.maximum(
        jnp.dot(v2d, wv_ref[...], preferred_element_type=jnp.float32)
        + bv_ref[...], 0.0)                                    # (BB*Nv, M)
    q_proj = jnp.maximum(
        jnp.dot(q2d, wq_ref[...], preferred_element_type=jnp.float32)
        + bq_ref[...], 0.0)                                    # (BB*Nq, M)

    v3 = v_proj.reshape(BB, Nv, M)
    q3 = q_proj.reshape(BB, Nq, M)

    # Fused-glimpse bilinear: (v * hw_g) @ q^T == v @ (q * hw_g)^T.
    # Scale the small q side per glimpse, stack glimpses along rows, and do a
    # single batched last-dim/last-dim contraction (no transpose relayout).
    hw = hw_ref[...].astype(jnp.float32)                       # (G, M)
    q_all = jnp.concatenate([q3 * hw[g] for g in range(G)], axis=1)   # (BB, G*Nq, M)
    raw = jnp.einsum('bvm,bkm->bvk', v3, q_all,
                     preferred_element_type=jnp.float32)       # (BB, Nv, G*Nq)

    mbias = mbias_ref[...].reshape(BB, L)                      # (BB, L)

    # Per glimpse: collapse to lane-dense (BB, 128), masked softmax, store.
    for g in range(G):                                         # G is tiny: static unroll
        lg = raw[:, :, g * Nq:(g + 1) * Nq].reshape(BB, L) + hb_ref[g]  # (BB, L)
        logits_ref[:, g, :] = lg
        masked = lg + mbias
        m = jnp.max(masked, axis=-1, keepdims=True)            # (BB, 1)
        e = jnp.exp(masked - m)
        s = jnp.sum(e, axis=-1, keepdims=True)
        atten_ref[:, g, :] = e / s                             # exact divide


def _pick_batch_block(batch, n_obj, target_rows=256):
    """Batches per grid step: fill the MXU rows (256 on v6e/v7x, >=128 on v5e)
    while keeping >= 2 grid steps when possible so v7x megacore stays busy."""
    bb = max(1, pl.cdiv(target_rows, n_obj))
    if batch >= 2 * bb:
        return bb
    if batch >= 2:
        return pl.cdiv(batch, 2)
    return batch


def biattention(v, q, v_mask, q_mask, params, *, batch_block=None,
                compute_dtype=jnp.float32):
    B, Nv, Dv = v.shape
    _, Nq, Dq = q.shape
    G, M = params["h_weight"].shape
    L = Nv * Nq

    # Lane-dense additive mask (0 / -inf), built once outside the kernel.
    mask_bias = jnp.where(
        (v_mask[:, :, None] == 0) | (q_mask[:, None, :] == 0),
        jnp.float32(-jnp.inf), jnp.float32(0.0)).reshape(B, 1, L)

    bb = _pick_batch_block(B, Nv) if batch_block is None else min(batch_block, B)
    n_steps = pl.cdiv(B, bb)
    Bp = n_steps * bb
    if Bp != B:
        pad = Bp - B
        v = jnp.pad(v, ((0, pad), (0, 0), (0, 0)))
        q = jnp.pad(q, ((0, pad), (0, 0), (0, 0)))
        # Padded batches keep a zero mask bias so their (discarded) softmax stays finite.
        mask_bias = jnp.pad(mask_bias, ((0, pad), (0, 0), (0, 0)))

    cd = compute_dtype
    v = v.astype(cd)
    q = q.astype(cd)
    wv = params["wv"].astype(cd)
    wq = params["wq"].astype(cd)
    hw = params["h_weight"].astype(cd)
    bv = params["bv"].astype(jnp.float32)
    bq = params["bq"].astype(jnp.float32)
    h_bias = params["h_bias"].reshape(G).astype(jnp.float32)     # SMEM scalars

    out_shape = (jax.ShapeDtypeStruct((Bp, G, L), jnp.float32),
                 jax.ShapeDtypeStruct((Bp, G, L), jnp.float32))

    in_specs = [
        pl.BlockSpec((bb, Nv, Dv), lambda i: (i, 0, 0)),       # v
        pl.BlockSpec((bb, Nq, Dq), lambda i: (i, 0, 0)),       # q
        pl.BlockSpec((bb, 1, L), lambda i: (i, 0, 0)),         # mask bias (lane-dense)
        pl.BlockSpec((Dv, M), lambda i: (0, 0)),               # Wv (resident)
        pl.BlockSpec((1, M), lambda i: (0, 0)),                # bv
        pl.BlockSpec((Dq, M), lambda i: (0, 0)),               # Wq (resident)
        pl.BlockSpec((1, M), lambda i: (0, 0)),                # bq
        pl.BlockSpec((G, M), lambda i: (0, 0)),                # h_weight (resident)
        pl.BlockSpec(memory_space=pltpu.MemorySpace.SMEM),     # h_bias scalars
    ]
    out_specs = [
        pl.BlockSpec((bb, G, L), lambda i: (i, 0, 0)),         # atten  (lane-dense)
        pl.BlockSpec((bb, G, L), lambda i: (i, 0, 0)),         # logits (lane-dense)
    ]

    atten_flat, logits_flat = pl.pallas_call(
        biattention_kernel,
        out_shape=out_shape,
        grid=(n_steps,),
        in_specs=in_specs,
        out_specs=out_specs,
        compiler_params=pltpu.CompilerParams(
            dimension_semantics=("parallel",)),
    )(v, q, mask_bias, wv, bv, wq, bq, hw, h_bias)

    return (atten_flat[:B].reshape(B, G, Nv, Nq),
            logits_flat[:B].reshape(B, G, Nv, Nq))


def reference_biattention(v, q, v_mask, q_mask, p):
    """Pure-JAX reference mirroring the PyTorch forward."""
    B, Nv, _ = v.shape
    _, Nq, _ = q.shape
    G = p["h_weight"].shape[0]
    v_ = jax.nn.relu(v @ p["wv"] + p["bv"][0])[:, None]                  # (B,1,Nv,M)
    q_ = jax.nn.relu(q @ p["wq"] + p["bq"][0])[:, None]                  # (B,1,Nq,M)
    h_ = v_ * p["h_weight"][None, :, None, :]                            # (B,G,Nv,M)
    logits = jnp.matmul(h_, jnp.swapaxes(q_, 2, 3))                      # (B,G,Nv,Nq)
    logits = logits + p["h_bias"].reshape(1, G, 1, 1)
    logits_out = logits
    neg_inf = -jnp.inf
    masked = jnp.where(v_mask[:, None, :, None] == 0, neg_inf, logits)
    masked = jnp.where(q_mask[:, None, None, :] == 0, neg_inf, masked)
    atten = jax.nn.softmax(masked.reshape(B, G, Nv * Nq), axis=2)
    return atten.reshape(B, G, Nv, Nq), logits_out


if __name__ == "__main__":
    # Shapes consistent with the module: batch=2, num_obj=16, que_len=8,
    # v_features=q_features=32, mid_features=32 (-> M = 32*3 = 96), glimpses=2.
    # Nv*Nq = 128 -> the flattened softmax axis is exactly one full lane row.
    B, Nv, Nq, Dv, Dq = 2, 16, 8, 32, 32
    mid_features, glimpses = 32, 2
    M = mid_features * 3

    key = jax.random.PRNGKey(0)
    k = jax.random.split(key, 12)

    params = {
        "wv": 0.05 * jax.random.normal(k[0], (Dv, M), jnp.float32),
        "bv": 0.05 * jax.random.normal(k[1], (1, M), jnp.float32),
        "wq": 0.05 * jax.random.normal(k[2], (Dq, M), jnp.float32),
        "bq": 0.05 * jax.random.normal(k[3], (1, M), jnp.float32),
        "h_weight": jax.random.normal(k[4], (glimpses, M), jnp.float32),   # torch (1,G,1,M)
        "h_bias": jax.random.normal(k[5], (glimpses,), jnp.float32),       # torch (1,G,1,1)
    }

    # --- Test 1: small batch (matches module defaults), f32 compute ---------
    v = jax.random.normal(k[6], (B, Nv, Dv), jnp.float32)
    q = jax.random.normal(k[7], (B, Nq, Dq), jnp.float32)
    v_mask = jnp.ones((B, Nv), jnp.float32).at[1, Nv - 4:].set(0.0)
    q_mask = jnp.ones((B, Nq), jnp.float32).at[1, Nq - 2:].set(0.0)

    atten, logits = biattention(v, q, v_mask, q_mask, params)
    jax.block_until_ready((atten, logits))

    ref_atten, ref_logits = reference_biattention(v, q, v_mask, q_mask, params)
    assert jnp.allclose(atten, ref_atten, atol=1e-4, rtol=1e-4), "atten mismatch (f32)"
    assert jnp.allclose(logits, ref_logits, atol=1e-4, rtol=1e-4), "logits mismatch (f32)"

    # --- Test 2: batch-blocked + padded path (BB=16, B not a multiple) ------
    B2 = 20
    v2 = jax.random.normal(k[8], (B2, Nv, Dv), jnp.float32)
    q2 = jax.random.normal(k[9], (B2, Nq, Dq), jnp.float32)
    vm2 = (jax.random.uniform(k[10], (B2, Nv)) > 0.2).astype(jnp.float32).at[:, 0].set(1.0)
    qm2 = (jax.random.uniform(k[11], (B2, Nq)) > 0.2).astype(jnp.float32).at[:, 0].set(1.0)

    atten2, logits2 = biattention(v2, q2, vm2, qm2, params, batch_block=16)
    jax.block_until_ready((atten2, logits2))
    ref_a2, ref_l2 = reference_biattention(v2, q2, vm2, qm2, params)
    assert jnp.allclose(atten2, ref_a2, atol=1e-4, rtol=1e-4), "atten mismatch (blocked)"
    assert jnp.allclose(logits2, ref_l2, atol=1e-4, rtol=1e-4), "logits mismatch (blocked)"

    # --- Test 3: bf16 activations/weights on the blocked path (loose check) -
    atten_bf, logits_bf = biattention(v2, q2, vm2, qm2, params, batch_block=16,
                                      compute_dtype=jnp.bfloat16)
    jax.block_until_ready((atten_bf, logits_bf))
    assert jnp.allclose(atten_bf, ref_a2, atol=0.1, rtol=0.1), "atten mismatch (bf16)"
    assert jnp.allclose(logits_bf, ref_l2, atol=0.1, rtol=0.1), "logits mismatch (bf16)"

    print("KERNEL_OK")
</pallas_src>

<mosaic_0001>
module attributes {stable_mosaic.version = 11 : i64} {
  func.func @biattention_kernel(%arg0: i32, %arg1: memref<1x16x32xf32, #tpu.memory_space<vmem>>, %arg2: memref<1x8x32xf32, #tpu.memory_space<vmem>>, %arg3: memref<1x1x128xf32, #tpu.memory_space<vmem>>, %arg4: memref<32x96xf32, #tpu.memory_space<vmem>>, %arg5: memref<1x96xf32, #tpu.memory_space<vmem>>, %arg6: memref<32x96xf32, #tpu.memory_space<vmem>>, %arg7: memref<1x96xf32, #tpu.memory_space<vmem>>, %arg8: memref<2x96xf32, #tpu.memory_space<vmem>>, %arg9: memref<2xf32, #tpu.memory_space<smem>>, %arg10: memref<1x2x128xf32, #tpu.memory_space<vmem>>, %arg11: memref<1x2x128xf32, #tpu.memory_space<vmem>>) attributes {dimension_semantics = [#tpu.dimension_semantics<parallel>], iteration_bounds = array<i64: 2>, scalar_prefetch = 0 : i64, scratch_operands = 0 : i64, tpu.core_type = #tpu.core_type<tc>, window_params = [{transform_indices = @transform_0, window_bounds = array<i64: 1, 16, 32>}, {transform_indices = @transform_1, window_bounds = array<i64: 1, 8, 32>}, {transform_indices = @transform_2, window_bounds = array<i64: 1, 1, 128>}, {pipeline_mode = #tpu.pipeline_mode<synchronous>, transform_indices = @transform_3, window_bounds = array<i64: 32, 96>}, {pipeline_mode = #tpu.pipeline_mode<synchronous>, transform_indices = @transform_4, window_bounds = array<i64: 1, 96>}, {pipeline_mode = #tpu.pipeline_mode<synchronous>, transform_indices = @transform_5, window_bounds = array<i64: 32, 96>}, {pipeline_mode = #tpu.pipeline_mode<synchronous>, transform_indices = @transform_6, window_bounds = array<i64: 1, 96>}, {pipeline_mode = #tpu.pipeline_mode<synchronous>, transform_indices = @transform_7, window_bounds = array<i64: 2, 96>}, {transform_indices = @transform_8, window_bounds = array<i64: 2>}, {transform_indices = @transform_9, window_bounds = array<i64: 1, 2, 128>}, {transform_indices = @transform_10, window_bounds = array<i64: 1, 2, 128>}]} {
    %c0 = arith.constant 0 : index
    %c0_0 = arith.constant 0 : index
    %c0_1 = arith.constant 0 : index
    %0 = vector.load %arg1[%c0, %c0_0, %c0_1] : memref<1x16x32xf32, #tpu.memory_space<vmem>>, vector<1x16x32xf32>
    %1 = vector.shape_cast %0 : vector<1x16x32xf32> to vector<16x32xf32>
    %c0_2 = arith.constant 0 : index
    %c0_3 = arith.constant 0 : index
    %c0_4 = arith.constant 0 : index
    %2 = vector.load %arg2[%c0_2, %c0_3, %c0_4] : memref<1x8x32xf32, #tpu.memory_space<vmem>>, vector<1x8x32xf32>
    %3 = vector.shape_cast %2 : vector<1x8x32xf32> to vector<8x32xf32>
    %c0_5 = arith.constant 0 : index
    %c0_6 = arith.constant 0 : index
    %4 = vector.load %arg4[%c0_5, %c0_6] : memref<32x96xf32, #tpu.memory_space<vmem>>, vector<32x96xf32>
    %cst = arith.constant dense<0.000000e+00> : vector<16x96xf32>
    %5 = tpu.matmul %1, %4, %cst {dimension_numbers = #tpu.dot_dimension_numbers<[1], [0], [0], [1], [0, 0, 1, 1], [], []>} : vector<16x32xf32>, vector<32x96xf32>, vector<16x96xf32> -> vector<16x96xf32>
    %c0_7 = arith.constant 0 : index
    %c0_8 = arith.constant 0 : index
    %6 = vector.load %arg5[%c0_7, %c0_8] : memref<1x96xf32, #tpu.memory_space<vmem>>, vector<1x96xf32>
    %7 = vector.broadcast %6 : vector<1x96xf32> to vector<16x96xf32>
    %8 = arith.addf %5, %7 : vector<16x96xf32>
    %cst_9 = arith.constant 0.000000e+00 : f32
    %9 = vector.broadcast %cst_9 : f32 to vector<16x96xf32>
    %10 = arith.maximumf %8, %9 : vector<16x96xf32>
    %c0_10 = arith.constant 0 : index
    %c0_11 = arith.constant 0 : index
    %11 = vector.load %arg6[%c0_10, %c0_11] : memref<32x96xf32, #tpu.memory_space<vmem>>, vector<32x96xf32>
    %cst_12 = arith.constant dense<0.000000e+00> : vector<8x96xf32>
    %12 = tpu.matmul %3, %11, %cst_12 {dimension_numbers = #tpu.dot_dimension_numbers<[1], [0], [0], [1], [0, 0, 1, 1], [], []>} : vector<8x32xf32>, vector<32x96xf32>, vector<8x96xf32> -> vector<8x96xf32>
    %c0_13 = arith.constant 0 : index
    %c0_14 = arith.constant 0 : index
    %13 = vector.load %arg7[%c0_13, %c0_14] : memref<1x96xf32, #tpu.memory_space<vmem>>, vector<1x96xf32>
    %14 = vector.broadcast %13 : vector<1x96xf32> to vector<8x96xf32>
    %15 = arith.addf %12, %14 : vector<8x96xf32>
    %cst_15 = arith.constant 0.000000e+00 : f32
    %16 = vector.broadcast %cst_15 : f32 to vector<8x96xf32>
    %17 = arith.maximumf %15, %16 : vector<8x96xf32>
    %18 = vector.shape_cast %10 : vector<16x96xf32> to vector<1x16x96xf32>
    %19 = vector.shape_cast %17 : vector<8x96xf32> to vector<1x8x96xf32>
    %c0_16 = arith.constant 0 : index
    %c0_17 = arith.constant 0 : index
    %20 = vector.load %arg8[%c0_16, %c0_17] : memref<2x96xf32, #tpu.memory_space<vmem>>, vector<2x96xf32>
    %21 = vector.extract_strided_slice %20 {offsets = [0, 0], sizes = [1, 96], strides = [1, 1]} : vector<2x96xf32> to vector<1x96xf32>
    %22 = vector.shape_cast %21 : vector<1x96xf32> to vector<96xf32>
    %23 = vector.shape_cast %22 : vector<96xf32> to vector<1x1x96xf32>
    %24 = vector.broadcast %23 : vector<1x1x96xf32> to vector<1x8x96xf32>
    %25 = arith.mulf %19, %24 : vector<1x8x96xf32>
    %26 = vector.extract_strided_slice %20 {offsets = [1, 0], sizes = [1, 96], strides = [1, 1]} : vector<2x96xf32> to vector<1x96xf32>
    %27 = vector.shape_cast %26 : vector<1x96xf32> to vector<96xf32>
    %28 = vector.shape_cast %27 : vector<96xf32> to vector<1x1x96xf32>
    %29 = vector.broadcast %28 : vector<1x1x96xf32> to vector<1x8x96xf32>
    %30 = arith.mulf %19, %29 : vector<1x8x96xf32>
    %31 = tpu.concatenate %25, %30 in 1 : vector<1x8x96xf32>, vector<1x8x96xf32> -> vector<1x16x96xf32>
    "tpu.trace_start"() <{level = 10 : i32, message = "bvm,bkm->bvk"}> : () -> ()
    %cst_18 = arith.constant dense<0.000000e+00> : vector<1x16x16xf32>
    %32 = tpu.matmul %18, %31, %cst_18 {dimension_numbers = #tpu.dot_dimension_numbers<[2], [2], [1], [1], [0, 0, 0, 1, 1, 1], [0], [0]>} : vector<1x16x96xf32>, vector<1x16x96xf32>, vector<1x16x16xf32> -> vector<1x16x16xf32>
    "tpu.trace_stop"() : () -> ()
    %c0_19 = arith.constant 0 : index
    %c0_20 = arith.constant 0 : index
    %c0_21 = arith.constant 0 : index
    %33 = vector.load %arg3[%c0_19, %c0_20, %c0_21] : memref<1x1x128xf32, #tpu.memory_space<vmem>>, vector<1x1x128xf32>
    %34 = vector.shape_cast %33 : vector<1x1x128xf32> to vector<1x128xf32>
    %35 = vector.extract_strided_slice %32 {offsets = [0, 0, 0], sizes = [1, 16, 8], strides = [1, 1, 1]} : vector<1x16x16xf32> to vector<1x16x8xf32>
    %36 = vector.shape_cast %35 : vector<1x16x8xf32> to vector<1x128xf32>
    %c0_22 = arith.constant 0 : index
    %37 = memref.load %arg9[%c0_22] : memref<2xf32, #tpu.memory_space<smem>>
    %38 = vector.broadcast %37 : f32 to vector<1x128xf32>
    %39 = arith.addf %36, %38 : vector<1x128xf32>
    %c0_23 = arith.constant 0 : index
    %c0_24 = arith.constant 0 : index
    %c0_25 = arith.constant 0 : index
    %40 = vector.load %arg11[%c0_23, %c0_24, %c0_25] : memref<1x2x128xf32, #tpu.memory_space<vmem>>, vector<1x1x128xf32>
    %41 = vector.shape_cast %40 : vector<1x1x128xf32> to vector<1x128xf32>
    %42 = vector.shape_cast %39 : vector<1x128xf32> to vector<1x1x128xf32>
    tpu.vector_store %arg11[%c0_23, %c0_24, %c0_25], %42 {strides = array<i32>} : memref<1x2x128xf32, #tpu.memory_space<vmem>>, vector<1x1x128xf32>,
    %43 = arith.addf %39, %34 : vector<1x128xf32>
    %cst_26 = arith.constant dense<0xFF800000> : vector<1xf32>
    %44 = vector.multi_reduction <maximumf>, %43, %cst_26 [1] : vector<1x128xf32> to vector<1xf32>
    %45 = vector.shape_cast %44 : vector<1xf32> to vector<1x1xf32>
    %46 = vector.broadcast %45 : vector<1x1xf32> to vector<1x128xf32>
    %47 = arith.subf %43, %46 : vector<1x128xf32>
    %48 = math.exp %47 : vector<1x128xf32>
    %cst_27 = arith.constant dense<0.000000e+00> : vector<1xf32>
    %49 = vector.multi_reduction <add>, %48, %cst_27 [1] : vector<1x128xf32> to vector<1xf32>
    %50 = vector.shape_cast %49 : vector<1xf32> to vector<1x1xf32>
    %51 = vector.broadcast %50 : vector<1x1xf32> to vector<1x128xf32>
    %52 = arith.divf %48, %51 : vector<1x128xf32>
    %c0_28 = arith.constant 0 : index
    %c0_29 = arith.constant 0 : index
    %c0_30 = arith.constant 0 : index
    %53 = vector.load %arg10[%c0_28, %c0_29, %c0_30] : memref<1x2x128xf32, #tpu.memory_space<vmem>>, vector<1x1x128xf32>
    %54 = vector.shape_cast %53 : vector<1x1x128xf32> to vector<1x128xf32>
    %55 = vector.shape_cast %52 : vector<1x128xf32> to vector<1x1x128xf32>
    tpu.vector_store %arg10[%c0_28, %c0_29, %c0_30], %55 {strides = array<i32>} : memref<1x2x128xf32, #tpu.memory_space<vmem>>, vector<1x1x128xf32>,
    %56 = vector.extract_strided_slice %32 {offsets = [0, 0, 8], sizes = [1, 16, 8], strides = [1, 1, 1]} : vector<1x16x16xf32> to vector<1x16x8xf32>
    %57 = vector.shape_cast %56 : vector<1x16x8xf32> to vector<1x128xf32>
    %c1 = arith.constant 1 : index
    %58 = memref.load %arg9[%c1] : memref<2xf32, #tpu.memory_space<smem>>
    %59 = vector.broadcast %58 : f32 to vector<1x128xf32>
    %60 = arith.addf %57, %59 : vector<1x128xf32>
    %c0_31 = arith.constant 0 : index
    %c1_32 = arith.constant 1 : index
    %c0_33 = arith.constant 0 : index
    %61 = vector.load %arg11[%c0_31, %c1_32, %c0_33] : memref<1x2x128xf32, #tpu.memory_space<vmem>>, vector<1x1x128xf32>
    %62 = vector.shape_cast %61 : vector<1x1x128xf32> to vector<1x128xf32>
    %63 = vector.shape_cast %60 : vector<1x128xf32> to vector<1x1x128xf32>
    tpu.vector_store %arg11[%c0_31, %c1_32, %c0_33], %63 {strides = array<i32>} : memref<1x2x128xf32, #tpu.memory_space<vmem>>, vector<1x1x128xf32>,
    %64 = arith.addf %60, %34 : vector<1x128xf32>
    %cst_34 = arith.constant dense<0xFF800000> : vector<1xf32>
    %65 = vector.multi_reduction <maximumf>, %64, %cst_34 [1] : vector<1x128xf32> to vector<1xf32>
    %66 = vector.shape_cast %65 : vector<1xf32> to vector<1x1xf32>
    %67 = vector.broadcast %66 : vector<1x1xf32> to vector<1x128xf32>
    %68 = arith.subf %64, %67 : vector<1x128xf32>
    %69 = math.exp %68 : vector<1x128xf32>
    %cst_35 = arith.constant dense<0.000000e+00> : vector<1xf32>
    %70 = vector.multi_reduction <add>, %69, %cst_35 [1] : vector<1x128xf32> to vector<1xf32>
    %71 = vector.shape_cast %70 : vector<1xf32> to vector<1x1xf32>
    %72 = vector.broadcast %71 : vector<1x1xf32> to vector<1x128xf32>
    %73 = arith.divf %69, %72 : vector<1x128xf32>
    %c0_36 = arith.constant 0 : index
    %c1_37 = arith.constant 1 : index
    %c0_38 = arith.constant 0 : index
    %74 = vector.load %arg10[%c0_36, %c1_37, %c0_38] : memref<1x2x128xf32, #tpu.memory_space<vmem>>, vector<1x1x128xf32>
    %75 = vector.shape_cast %74 : vector<1x1x128xf32> to vector<1x128xf32>
    %76 = vector.shape_cast %73 : vector<1x128xf32> to vector<1x1x128xf32>
    tpu.vector_store %arg10[%c0_36, %c1_37, %c0_38], %76 {strides = array<i32>} : memref<1x2x128xf32, #tpu.memory_space<vmem>>, vector<1x1x128xf32>,
    return
  }
  func.func @transform_0(%arg0: i32) -> (i32, i32, i32) {
    %c0_i32 = arith.constant 0 : i32
    %c0_i32_0 = arith.constant 0 : i32
    %c0_i32_1 = arith.constant 0 : i32
    return %arg0, %c0_i32, %c0_i32_0 : i32, i32, i32
  }
  func.func @transform_1(%arg0: i32) -> (i32, i32, i32) {
    %c0_i32 = arith.constant 0 : i32
    %c0_i32_0 = arith.constant 0 : i32
    %c0_i32_1 = arith.constant 0 : i32
    return %arg0, %c0_i32, %c0_i32_0 : i32, i32, i32
  }
  func.func @transform_2(%arg0: i32) -> (i32, i32, i32) {
    %c0_i32 = arith.constant 0 : i32
    %c0_i32_0 = arith.constant 0 : i32
    %c0_i32_1 = arith.constant 0 : i32
    return %arg0, %c0_i32, %c0_i32_0 : i32, i32, i32
  }
  func.func @transform_3(%arg0: i32) -> (i32, i32) {
    %c0_i32 = arith.constant 0 : i32
    %c0_i32_0 = arith.constant 0 : i32
    %c0_i32_1 = arith.constant 0 : i32
    return %c0_i32, %c0_i32_0 : i32, i32
  }
  func.func @transform_4(%arg0: i32) -> (i32, i32) {
    %c0_i32 = arith.constant 0 : i32
    %c0_i32_0 = arith.constant 0 : i32
    %c0_i32_1 = arith.constant 0 : i32
    return %c0_i32, %c0_i32_0 : i32, i32
  }
  func.func @transform_5(%arg0: i32) -> (i32, i32) {
    %c0_i32 = arith.constant 0 : i32
    %c0_i32_0 = arith.constant 0 : i32
    %c0_i32_1 = arith.constant 0 : i32
    return %c0_i32, %c0_i32_0 : i32, i32
  }
  func.func @transform_6(%arg0: i32) -> (i32, i32) {
    %c0_i32 = arith.constant 0 : i32
    %c0_i32_0 = arith.constant 0 : i32
    %c0_i32_1 = arith.constant 0 : i32
    return %c0_i32, %c0_i32_0 : i32, i32
  }
  func.func @transform_7(%arg0: i32) -> (i32, i32) {
    %c0_i32 = arith.constant 0 : i32
    %c0_i32_0 = arith.constant 0 : i32
    %c0_i32_1 = arith.constant 0 : i32
    return %c0_i32, %c0_i32_0 : i32, i32
  }
  func.func @transform_8(%arg0: i32) -> i32 {
    %c0_i32 = arith.constant 0 : i32
    %c0_i32_0 = arith.constant 0 : i32
    return %c0_i32 : i32
  }
  func.func @transform_9(%arg0: i32) -> (i32, i32, i32) {
    %c0_i32 = arith.constant 0 : i32
    %c0_i32_0 = arith.constant 0 : i32
    %c0_i32_1 = arith.constant 0 : i32
    return %arg0, %c0_i32, %c0_i32_0 : i32, i32, i32
  }
  func.func @transform_10(%arg0: i32) -> (i32, i32, i32) {
    %c0_i32 = arith.constant 0 : i32
    %c0_i32_0 = arith.constant 0 : i32
    %c0_i32_1 = arith.constant 0 : i32
    return %arg0, %c0_i32, %c0_i32_0 : i32, i32, i32
  }
}

</mosaic_0001>

<bundles_post_ra>
// kernel: tpu_custom_call.1
= control target key start
LH: loop header
LB: loop body
LE: loop exit
PB: predicated region body
PF: predicated region fallthrough
CT: control target
= control target key end

     0   :  { %s2419_s0 = inlined_call_operand.hbm [shape: f32[2,16,32], index: 0, kind: input, shape index: {}]   ;;  %s2420_s1 = inlined_call_operand.hbm [shape: f32[2,8,32], index: 1, kind: input, shape index: {}]   ;;  %s2421_s2 = inlined_call_operand.vmem [shape: f32[2,1,128], index: 2, kind: input, shape index: {}]   ;;  %s2422_s3 = inlined_call_operand.hbm [shape: f32[32,96], index: 3, kind: input, shape index: {}]   ;;  %s2423_s4 = inlined_call_operand.vmem [shape: f32[1,96], index: 4, kind: input, shape index: {}]   ;;  %s2424_s5 = inlined_call_operand.hbm [shape: f32[32,96], index: 5, kind: input, shape index: {}]   ;;  %s2425_s6 = inlined_call_operand.vmem [shape: f32[1,96], index: 6, kind: input, shape index: {}]   ;;  %s2426_s7 = inlined_call_operand.vmem [shape: f32[2,96], index: 7, kind: input, shape index: {}]   ;;  %s2427_s8 = inlined_call_operand.vmem [shape: f32[2], index: 8, kind: input, shape index: {}]   ;;  %s2428_s9 = inlined_call_operand.hbm [shape: f32[2,2,128], index: 9, kind: output, shape index: {0}]   ;;  %s2429_s10 = inlined_call_operand.hbm [shape: f32[2,2,128], index: 10, kind: output, shape index: {1}]  }
   0x1   :  { %2438 = sst [smem:[#allocation25_spill]] %s2419_s0 }
   0x2   :  { %2439 = sst [smem:[#allocation26_spill]] %s2422_s3 }
   0x3   :  { %2440 = sst [smem:[#allocation27_spill]] %s2424_s5 }
   0x4   :  { %2441 = sst [smem:[#allocation28_spill]] %s2427_s8 }
   0x5   :  { %2442 = sst [smem:[#allocation29_spill]] %s2428_s9 }
   0x6   :  { %16 = vsyncpa [#allocation3], 0 }
   0x7   :  { %18 = vsyncpa [#allocation3 + $0x1], 0 }
   0x8   :  { %19 = vsyncpa [#allocation7], 0 }
   0x9   :  { %21 = vsyncpa [#allocation7 + $0x1], 0 }
   0xa   :  { %22 = vsyncpa [#allocation10], 0 }
   0xb   :  { %23 = vsyncpa [#allocation5], 0 }
   0xc   :  { %24 = vsyncpa [#allocation4], 0 }
   0xd   :  { %26 = vsyncpa [#allocation4 + $0x1], 0 }
   0xe   :  { %27 = vsyncpa [#allocation14], 0 }
   0xf   :  { %29 = vsyncpa [#allocation14 + $0x1], 0  ;;  %s1913_s13 = smov 0   ;;  %s1915_s14 = smov 0  }
  0x10   :  { %s1917_s15 = smov 0   ;;  %s1919_s16 = smov 0  }
  0x11 LB: > { %2443 = sst [smem:[#allocation22_spill]] %s1815_s13  ;;  %s1934_s17 = sadd.s32 4294967295, %s1827_s16   ;;  %s1827_s16 = sphi %s1919_s16, %s2478_s16   ;;  %s1823_s15 = sphi %s1917_s15, %s2477_s15   ;;  %s1819_s14 = sphi %s1915_s14, %s2476_s14   ;;  %s1815_s13 = sphi %s1913_s13, %s2475_s13  }
  0x12   : > { %s1365_s18 = sadd.s32 4294967294, %s1827_s16   ;;  %p55_p0 = scmp.ne.s32.totalorder %s1819_s14, %s1815_s13 }
  0x13   : > { %p2431_p1 = scmp.eq.s32.totalorder %s1934_s17, 0  ;;  %p263_p3 = scmp.eq.s32.totalorder %s1365_s18, 1 }
  0x14   : > { %p1366_p5 = scmp.ge.s32.totalorder %s1827_s16, 1  ;;  %p296_p7 = scmp.lt.s32.totalorder %s1827_s16, 3 }
  0x15   : > { %p1943_p4 = por %p2431_p1, %p55_p0  ;;  %p1948_p6 = por %p263_p3, %p55_p0 }
  0x16   : > { %p1953_p8 = pnand %p1366_p5, %p296_p7  ;;  %s1829_s22 = smov [#allocation8]  }
  0x17   : > { %s2444_s19 = scalar_select %p1943_p4, 1, 0 }
  0x18   : > { %s2445_s20 = scalar_select %p1948_p6, 1, 0 }
  0x19   : > { %s2447_s21 = scalar_select %p1953_p8, 1, 0 }
  0x1a   : > { %2446 = sst [smem:[#allocation23_spill]] %s2445_s20  ;;  %s308_s23 = sshll.u32 %s1829_s22, 4  ;;  %s1957_s23 = int_to_ptr.vmem [resolvable:$true] %s308_s23 }
  0x1b   : > { %p1485_p9 = pneg %p1953_p8  ;;  %s1830_s25 = smov [#allocation9]  }
  0x1c   : > { %s324_s26 = sshll.u32 %s1830_s25, 4  ;;  %s2449_s8 = sld [smem:[#allocation28_spill]]  ;;  %s1968_s26 = int_to_ptr.vmem [resolvable:$true] %s324_s26 }
  0x1d   : > { %p1964_p11 = pnand %p1485_p9, %p2431_p1  ;;  %s2450_s3 = sld [smem:[#allocation26_spill]] }
  0x1f   : > { %p1983_p13 = pneg %p1964_p11 }
  0x22   : > { %s344_s29 = sshll.u32 %s2449_s8, 4  ;;  %s1973_s29 = int_to_ptr.vmem [resolvable:$true] %s344_s29 }
  0x23   : > { %s1582_s12 = scalar_lea.hbm %s2450_s3, 512 }
  0x24   : > { %p1583_p12 = scmp.ne.s32.totalorder %s2450_s3, %s1582_s12  ;;  %p1589_p5 = scmp.lt.u32.totalorder %s1582_s12, %s2450_s3 }
  0x26   : > { %p1585_p0 = pnand %p1983_p13, %p1583_p12 }
  0x28   : > { %p1586_p3 = pneg %p1585_p0 }
  0x2a   : > { %p1591_p7 = pnand %p1589_p5, %p1586_p3 }
  0x2c   : > { %1594 = shalt.err (!%p1591_p7)
}
  0x2d   : > { %s1595_s28 = scalar_lea.vmem %s1957_s23, 512  ;;  %p1603_p2 = scmp.lt.s32.totalorder %s1957_s23, %s1957_s23 }
  0x2e   : > { %p1596_p9 = scmp.ne.s32.totalorder %s1957_s23, %s1595_s28  ;;  %p1604_p6 = scmp.lt.s32.totalorder %s1595_s28, %s1595_s28 }
  0x30   : > { %p1598_p10 = pnand %p1596_p9, %p1983_p13  ;;  %p1605_p12 = por %p1604_p6, %p1603_p2 }
  0x32   : > { %p1599_p1 = pneg %p1598_p10 }
  0x34   : > { %p1606_p0 = pnand %p1605_p12, %p1599_p1 }
  0x36   : > { %1609 = shalt.err (!%p1606_p0)
}
  0x37   : > { %s2434_s30 = smov 128   ;;  %s1832_s11 = smov 8  }
  0x38   : > { %1488 = dma.hbm_to_vmem [thread:$0]  (!%p1964_p11), %s2450_s3, 512, %s1957_s23, [#allocation7], %s2434_s30, %s2434_s30, %s1832_s11  }
  0x39   : > { %s2452_s5 = sld [smem:[#allocation27_spill]] }
  0x3f   : > { %s1610_s27 = scalar_lea.hbm %s2452_s5, 512 }
  0x40   : > { %p1611_p1 = scmp.ne.s32.totalorder %s2452_s5, %s1610_s27  ;;  %p1617_p10 = scmp.lt.u32.totalorder %s1610_s27, %s2452_s5 }
  0x42   : > { %p1613_p2 = pnand %p1611_p1, %p1983_p13 }
  0x44   : > { %p1614_p6 = pneg %p1613_p2 }
  0x46   : > { %p1619_p3 = pnand %p1617_p10, %p1614_p6 }
  0x48   : > { %1622 = shalt.err (!%p1619_p3)
}
  0x49   : > { %s1623_s23 = scalar_lea.vmem %s1968_s26, 512  ;;  %p1631_p12 = scmp.lt.s32.totalorder %s1968_s26, %s1968_s26 }
  0x4a   : > { %p1624_p5 = scmp.ne.s32.totalorder %s1968_s26, %s1623_s23  ;;  %p1632_p0 = scmp.lt.s32.totalorder %s1623_s23, %s1623_s23 }
  0x4c   : > { %p1626_p7 = pnand %p1624_p5, %p1983_p13  ;;  %p1633_p1 = por %p1632_p0, %p1631_p12 }
  0x4e   : > { %p1627_p9 = pneg %p1626_p7 }
  0x50   : > { %p1634_p2 = pnand %p1633_p1, %p1627_p9 }
  0x52   : > { %1637 = shalt.err (!%p1634_p2)
}
  0x53   : > { %1491 = dma.hbm_to_vmem [thread:$0]  (!%p1964_p11), %s2452_s5, 512, %s1968_s26, [#allocation10], %s2434_s30, %s2434_s30, %s1832_s11  }
  0x54   : > { %s1638_s13 = scalar_lea.vmem %s1973_s29, 16  ;;  %p1646_p5 = scmp.lt.s32.totalorder %s1973_s29, %s1973_s29 }
  0x55   : > { %p1639_p6 = scmp.ne.s32.totalorder %s1973_s29, %s1638_s13  ;;  %p1647_p7 = scmp.lt.s32.totalorder %s1638_s13, %s1638_s13 }
  0x57   : > { %p1641_p10 = pnand %p1639_p6, %p1983_p13  ;;  %p1648_p9 = por %p1647_p7, %p1646_p5 }
  0x59   : > { %p1642_p3 = pneg %p1641_p10 }
  0x5b   : > { %p1649_p12 = pnand %p1648_p9, %p1642_p3 }
  0x5d   : > { %1652 = shalt.err (!%p1649_p12)
}
  0x5e   : > { %s1833_s12 = smov [#allocation11]   ;;  %s2043_s20 = sadd.s32 1, %s1827_s16  }
  0x5f   : > { %1494 = dma.vmem_to_smem (!%p1964_p11), %s1973_s29, 16, %s1833_s12, [#allocation5]  }
  0x60   : > { %s39_s26 = ssub.s32 %s1827_s16, %s2043_s20  ;;  %s42_s18 = sadd.s32 1, %s1823_s15 }
  0x61   : > { %p40_p13 = scmp.eq.s32.totalorder %s39_s26, 0  ;;  %p49_p0 = scmp.ne.s32.totalorder %s1823_s15, %s1819_s14 }
  0x62   : > { %p50_p1 = scmp.eq.s32.totalorder %s1827_s16, 0  ;;  %p1512_p2 = scmp.lt.s32.totalorder %s1827_s16, 2 }
  0x63   : > { %s2053_s24 = scalar_select %p40_p13, %s1823_s15, %s42_s18  }
  0x64   : > { %p51_p6 = por %p50_p1, %p49_p0  ;;  %p2454_p10 = scmp.eq.s32.totalorder %s1934_s17, 1 }
  0x65   : > { %2453 = sst [smem:[#allocation24_spill]] %s2053_s24  ;;  %s2062_s25 = sand.u32 1, %s1823_s15  }
  0x66   : > { %p2057_p3 = por %p2454_p10, %p49_p0  ;;  %s1400_s29 = sshll.u32 %s1827_s16, 8 }
  0x67   : > { %s1371_s27 = sshll.u32 %s2062_s25, 4  ;;  %s2456_s0 = sld [smem:[#allocation25_spill]] }
  0x68   : > { %s2455_s22 = scalar_select %p2057_p3, 1, 0 }
  0x69   : > { %s359_s9 = scalar_lea.vmem [#allocation2], %s1371_s27  ;;  %p2071_p11 = pnand %p1512_p2, %p51_p6 }
  0x6a   : > { %s366_s13 = sshll.u32 %s359_s9, 4  ;;  %s356_s18 = scalar_lea.sflag [#allocation3], %s2062_s25  ;;  %s2075_s13 = int_to_ptr.vmem [resolvable:$true] %s366_s13 }
  0x6b   : > { %p1655_p7 = pneg %p2071_p11 }
  0x6d   : > { %s2069_s8 = scalar_lea.hbm %s2456_s0, %s1400_s29  ;;  %s1658_s28 = scalar_lea.hbm %s2456_s0, 512 }
  0x6e   : > { %s1653_s30 = scalar_lea.hbm %s2069_s8, 256  ;;  %p1659_p13 = scmp.lt.u32.totalorder %s2069_s8, %s2456_s0 }
  0x6f   : > { %p1654_p5 = scmp.ne.s32.totalorder %s2069_s8, %s1653_s30  ;;  %p1660_p0 = scmp.lt.u32.totalorder %s1658_s28, %s1653_s30 }
  0x70   : > { %p1662_p2 = scmp.lt.u32.totalorder %s1653_s30, %s2069_s8 }
  0x71   : > { %p1656_p9 = pnand %p1655_p7, %p1654_p5  ;;  %p1661_p1 = por %p1660_p0, %p1659_p13 }
  0x73   : > { %p1657_p12 = pneg %p1656_p9  ;;  %p1663_p6 = por %p1662_p2, %p1661_p1 }
  0x75   : > { %p1664_p10 = pnand %p1663_p6, %p1657_p12 }
  0x77   : > { %1667 = shalt.err (!%p1664_p10)
}
  0x78   : > { %s1668_s26 = scalar_lea.vmem %s2075_s13, 256  ;;  %s1834_s29 = smov [#allocation2]  }
  0x79   : > { %p1669_p5 = scmp.ne.s32.totalorder %s2075_s13, %s1668_s26  ;;  %s1673_s27 = sshll.u32 %s1834_s29, 4  ;;  %s1674_s27 = int_to_ptr.vmem [resolvable:$false] %s1673_s27 }
  0x7a   : > { %s1675_s23 = scalar_lea.vmem %s1674_s27, 512  ;;  %p1676_p4 = scmp.lt.s32.totalorder %s2075_s13, %s1674_s27 }
  0x7b   : > { %p1671_p9 = pnand %p1669_p5, %p1655_p7  ;;  %p1677_p13 = scmp.lt.s32.totalorder %s1675_s23, %s1668_s26 }
  0x7d   : > { %p1672_p3 = pneg %p1671_p9  ;;  %p1678_p0 = por %p1677_p13, %p1676_p4 }
  0x7f   : > { %p1679_p1 = pnand %p1678_p0, %p1672_p3 }
  0x81   : > { %1682 = shalt.err (!%p1679_p1)
}
  0x82   : > { %s2458_s30 = smov 128   ;;  %s1374_s28 = sshll.u32 %s2062_s25, 3 }
  0x83   : > { %1498 = dma.hbm_to_vmem [thread:$0]  (!%p2071_p11), %s2069_s8, 256, %s2075_s13, %s356_s18, %s2458_s30, %s2458_s30, %s1832_s11  }
  0x84   : > { %s1375_s9 = sshll.u32 %s1827_s16, 7  ;;  %s380_s23 = scalar_lea.vmem [#allocation6], %s1374_s28 }
  0x85   : > { %s2114_s27 = scalar_lea.hbm %s2420_s1, %s1375_s9  ;;  %s387_s0 = sshll.u32 %s380_s23, 4  ;;  %s388_s0 = int_to_ptr.vmem [resolvable:$true] %s387_s0 }
  0x86   : > { %s2459_s3 = sand.u32 1, %s1827_s16   ;;  %s1683_s24 = scalar_lea.hbm %s2114_s27, 128 }
  0x87   : > { %s377_s5 = scalar_lea.sflag [#allocation7], %s2459_s3  ;;  %p1684_p4 = scmp.ne.s32.totalorder %s2114_s27, %s1683_s24 }
  0x88   : > { %s1688_s8 = scalar_lea.hbm %s2420_s1, 256  ;;  %p1689_p2 = scmp.lt.u32.totalorder %s2114_s27, %s2420_s1 }
  0x89   : > { %p1686_p3 = pnand %p1684_p4, %p1655_p7  ;;  %p1690_p6 = scmp.lt.u32.totalorder %s1688_s8, %s1683_s24 }
  0x8a   : > { %p1692_p5 = scmp.lt.u32.totalorder %s1683_s24, %s2114_s27 }
  0x8b   : > { %p1687_p12 = pneg %p1686_p3  ;;  %p1691_p10 = por %p1690_p6, %p1689_p2 }
  0x8d   : > { %p1693_p9 = por %p1692_p5, %p1691_p10 }
  0x8f   : > { %p1694_p13 = pnand %p1693_p9, %p1687_p12 }
  0x91   : > { %1697 = shalt.err (!%p1694_p13)
}
  0x92   : > { %s1698_s3 = scalar_lea.vmem %s388_s0, 128  ;;  %s1835_s30 = smov [#allocation6]  }
  0x93   : > { %p1699_p0 = scmp.ne.s32.totalorder %s388_s0, %s1698_s3  ;;  %s1703_s28 = sshll.u32 %s1835_s30, 4  ;;  %s1704_s28 = int_to_ptr.vmem [resolvable:$false] %s1703_s28 }
  0x94   : > { %s1705_s9 = scalar_lea.vmem %s1704_s28, 256  ;;  %p1706_p3 = scmp.lt.s32.totalorder %s388_s0, %s1704_s28 }
  0x95   : > { %p1701_p1 = pnand %p1699_p0, %p1655_p7  ;;  %p1707_p8 = scmp.lt.s32.totalorder %s1705_s9, %s1698_s3 }
  0x97   : > { %p1702_p4 = pneg %p1701_p1  ;;  %p1708_p2 = por %p1707_p8, %p1706_p3 }
  0x99   : > { %p1709_p6 = pnand %p1708_p2, %p1702_p4 }
  0x9b   : > { %1712 = shalt.err (!%p1709_p6)
}
  0x9c   : > { %1501 = dma.hbm_to_vmem [thread:$0]  (!%p2071_p11), %s2114_s27, 128, %s388_s0, %s377_s5  }
  0x9d   : > { %p2460_p12 = scmp.ne.s32.totalorder %s2447_s21, 0 }
  0x9e   : > { %s2140_s24 = sand.u32 (!%p2460_p12), 1, %s1819_s14   ;;  %p2461_p8 = scmp.ne.s32.totalorder (!%p2460_p12), %s2444_s19, 0 }
  0x9f   : > { %402 = sbr.rel (%p2460_p12) target bundleno = 1260 (0x4ec), region = 56  ;;  %s1377_s26 = sshll.u32 (!%p2460_p12), %s2140_s24, 4 }
  0xa0   : > { %s405_s29 = scalar_lea.sflag (!%p2460_p12), [#allocation3], %s2140_s24  ;;  %s2144_s23 = scalar_lea.vmem (!%p2460_p12), [#allocation2], %s1377_s26 }
  0xa6   : > { %1786 = dma.done.wait (%p2461_p8), %s405_s29, 256  }
  0xa7   : > { %1788 = vsyncadd (%p2461_p8), %s405_s29, 4294967040  ;;  %s413_s0 = sand.u32 1, %s1934_s17   ;;  %s1378_s5 = sshll.u32 %s2140_s24, 3 }
  0xa8   : > { %s414_s21 = scalar_lea.sflag [#allocation7], %s413_s0  ;;  %s2152_s12 = scalar_lea.vmem [#allocation6], %s1378_s5 }
  0xa9   : > { %1790 = dma.done.wait (%p2461_p8), %s414_s21, 128  }
  0xaa   : > { %1792 = vsyncadd (%p2461_p8), %s414_s21, 4294967168  ;;  %p2462_p11 = scmp.eq.s32.totalorder %s1934_s17, 0 }
  0xac   : > { %1794 = dma.done.wait (%p2462_p11), [#allocation7], 512   ;;  %p2463_p7 = pmov %p2462_p11 }
  0xae   : > { %1796 = vsyncadd (%p2463_p7), [#allocation7], 4294966784  ;;  %p2464_p10 = pmov %p2463_p7 }
  0xaf   : > { %p2465_p5 = pmov %p2463_p7 }
  0xb0   : > { %1798 = dma.done.wait (%p2464_p10), [#allocation10], 512  }
  0xb1   : > { %1800 = vsyncadd (%p2465_p5), [#allocation10], 4294966784  ;;  %p2466_p9 = pmov %p2465_p5 }
  0xb2   : > { %p2467_p13 = pmov %p2465_p5 }
  0xb3   : > { %1802 = dma.done.wait (%p2466_p9), [#allocation5], 16  }
  0xb4   : > { %1804 = vsyncadd (%p2467_p13), [#allocation5], 4294967280 }
  0xb5   : > { %434 = sfence }
  0xb6   : > { %v581_v0 = vld [vmem:[#allocation9] sm:$0xff]  ;;  %v582_v1 = vld [vmem:[#allocation9 + $0x8] sm:$0xff]  ;;  %v583_v2 = vld [vmem:[#allocation9 + $0x10] sm:$0xff]  ;;  %v1836_v3 = vmov 0.0|0.0   ;;  %vm1837_vm0 = vmmov 0   ;;  %v1838_v6 = vmov 0.0   ;;  %v667_v17 = vlaneseq }
  0xb7   : > { %1453 = vmatprep.subr.bf16.mxu1 %v1836_v3  ;;  %v1454_v4 = vpack.c.bf16 %v582_v1, %v581_v0  ;;  %v584_v5 = vld [vmem:[#allocation9 + $0x18] sm:$0xff]  ;;  %1435 = vmatprep.mubr.msk.f32.mxu1 %vm1837_vm0, %v1838_v6  ;;  %v486_v7 = vld [vmem:[#allocation8] sm:$0xff]  ;;  %v487_v8 = vld [vmem:[#allocation8 + $0x8] sm:$0xff]  ;;  %vm497_vm1 = vcmask 261120   ;;  %vm677_vm2 = vcmask 785408   ;;  %s1841_s18 = smov 120  }
  0xb8   : > { %v488_v9 = vld [vmem:[#allocation8 + $0x10] sm:$0xff]  ;;  %v489_v10 = vld [vmem:[#allocation8 + $0x18] sm:$0xff]  ;;  %v1457_v11 = vpack.c.bf16 %v584_v5, %v583_v2  ;;  %v1445_v12 = vpack.c.bf16 %v487_v8, %v486_v7  ;;  %v668_v18 = vshrl.u32 %v667_v17, 7  ;;  %vm1460_vm3 = vmpackc.low %vm677_vm2, %vm677_vm2  ;;  %v1839_v39 = vmov 1983009808   ;;  %s1842_s3 = smov 8  }
  0xb9   : > { %1455 = vmatpush3.bf16.msra.mxu1 %v1454_v4  ;;  %v1449_v13 = vpack.c.bf16 %v489_v10, %v488_v9  ;;  %v483_v14 = vld [vmem:[%s2144_s23] sm:$0xff]  ;;  %v484_v16 = vld [vmem:[%s2144_s23 + $0x8] sm:$0xff]  ;;  %v768_v40 = vunpack.c.l.s4 %v1839_v39  ;;  %v1840_v41 = vmov 1934713408   ;;  %s1843_s30 = smov 64   ;;  %s1844_s28 = smov 72  }
  0xba   : > { %1456 = vmatprep.subr.bf16.mxu1 %v1836_v3  ;;  %1424 = vmatprep.mubr.msk.f32.mxu0 %vm497_vm1, %v483_v14  ;;  %v485_v15 = vld [vmem:[%s2152_s12] sm:$0xff]  ;;  %v669_v19 = vsub.s32 0, %v668_v18  ;;  %v674_v20 = vsub.s32 1, %v668_v18  ;;  %v783_v42 = vunpack.c.l.s4 %v1840_v41  ;;  %s1845_s9 = smov 80   ;;  %s1846_s26 = smov 96   ;;  %vm924_vm4 = vcmask 64512  }
  0xbb   : > { %1446 = vmatprep.subr.bf16.mxu0 %v1445_v12  ;;  %v1387_v21 = vld [vmem:[%s2425_s6] ss:$0 sm:$0xff]  ;;  %v769_v43 = vunpack.c.0.s8 %v768_v40  ;;  %s1847_s29 = smov 16   ;;  %s1848_s23 = smov 32   ;;  %vm926_vm5 = vcmask 130048   ;;  %vm928_vm6 = vcmask 195584  }
  0xbc   : > { %1448 = vmatpush3.bf16.msra.mxu0 %v1445_v12  ;;  %v666_v22 = vld [vmem:[%s2426_s7] sm:$0x3]  ;;  %v784_v44 = vunpack.c.0.s8 %v783_v42  ;;  %s1849_s0 = smov 88   ;;  %s1850_s5 = smov 104   ;;  %vm931_vm7 = vcmask 326656   ;;  %vm933_vm8 = vcmask 392192  }
  0xbd   : > { %1458 = vmatpush3.bf16.msra.mxu1 %v1457_v11  ;;  %1450 = vmatprep.subr.bf16.mxu0 %v1449_v13  ;;  %v670_v25 = vrot.slane %v666_v22, %v669_v19  ;;  %v675_v26 = vrot.slane %v666_v22, %v674_v20  ;;  %v1384_v28 = vld [vmem:[%s2423_s4] ss:$0 sm:$0xff]  ;;  %v2190_v45 = vsub.s32 %v769_v43, %v668_v18  ;;  %s1851_s21 = smov 24   ;;  %s1852_s12 = smov 40   ;;  %vm935_vm9 = vcmask 457728  }
  0xbe   : > { %v2192_v46 = vsub.s32 %v784_v44, %v668_v18  ;;  %s1853_s19 = smov 48   ;;  %s1854_s27 = smov 56   ;;  %vm937_vm10 = vcmask 523264   ;;  %vm939_vm11 = vcmask 588800   ;;  %vm941_vm12 = vcmask 654336  }
  0xbf   : > { %s1855_s11 = smov 112   ;;  %p480_p0 = scmp.lt.s32.totalorder %s1934_s17, 1  ;;  %vm943_vm13 = vcmask 719872   ;;  %vm946_vm14 = vcmask 850944   ;;  %vm948_vm15 = vcmask 916480   ;;  %vm950_vm0 = vcmask 982016  }
  0xc0   : > { %1436 = vmatmul.mubr.msk.f32.vlgmr.msra.gmra.mrb[0].mxu1 %vm497_vm1, %v485_v15  ;;  %1452 = vmatpush3.bf16.msra.mxu0 %v1449_v13  ;;  %s2287_s25 = sld [smem:[#allocation11]]  ;;  %s1382_s13 = sshll.u32 %s2140_s24, 1 }
  0xc1   : > { %s481_s8 = scalar_select %p480_p0, %s1934_s17, 1 }
  0xc2   : > { %p2468_p4 = scmp.ne.s32.totalorder %s2455_s22, 0 }
  0xc3   : > { %1425 = vmatmul.mubr.msk.f32.vlgmr.msra.gmra.mrb[0].mxu0 %vm497_vm1, %v484_v16 }
 0x193   : > { %v661_v23 = vpop.f32.mrb[0].mxu1 }
 0x194   : > { %v662_v24 = vadd.f32 %v1387_v21, %v661_v23  ;;  %v1437_v27 = vpop.f32.mrb[1].mxu1 }
 0x196   : > { %v665_v29 = vmax.f32 %v662_v24, 0.0  ;;  %v1426_v30 = vpop.f32.mrb[0].mxu0 }
 0x197   : > { %v570_v31 = vpop.f32.mrb[1].mxu0  ;;  %v576_v37 = vadd.f32 %v1426_v30, %v1384_v28 }
 0x198   : > { %v671_v32 = vmul.f32 %v670_v25, %v665_v29  ;;  %v676_v33 = vmul.f32 %v675_v26, %v665_v29  ;;  %v571_v34 = vadd.f32 %v1384_v28, %v570_v31 }
 0x199   : > { %v580_v38 = vmax.f32 %v576_v37, 0.0 }
 0x19a   : > { %v1459_v35 = vpack.c.bf16 %v676_v33, %v671_v32  ;;  %v579_v36 = vmax.f32 %v571_v34, 0.0 }
 0x19c   : > { %1461 = vmatprep.subr.msk.bf16.mxu0 %vm1460_vm3, %v1459_v35  ;;  %1442 = vmatprep.mubr.msk.f32.mxu0 %vm677_vm2, %v579_v36 }
 0x19d   : > { %1464 = vmatpush3.bf16.xpose.msk.msra.mxu0 %vm1460_vm3, %v1459_v35  ;;  %vm957_vm3 = vcmask 1040384  }
 0x1a4   : > { %1443 = vmatmul.mubr.msk.f32.vlgmr.msra.gmra.mrb[2].mxu0 %vm677_vm2, %v580_v38 }
 0x277   : > { %v1444_v47 = vpop.f32.mrb[2].mxu0 }
 0x278   : > { %v756_v48 = vpop.f32.mrb[3].mxu0  ;;  %v822_v50 = vrot.slane %v1444_v47, %v2190_v45  ;;  %v815_v54 = vcombine.high %v1444_v47, %v1838_v6 }
 0x279   : > { %v773_v49 = vrot.slane %v756_v48, %v2190_v45  ;;  %972 = vrot.lane.b32.xlu0 %v756_v48, %s1841_s18  ;;  %v766_v59 = vcombine.high %v756_v48, %v1838_v6 }
 0x27a   : > { %v837_v53 = vrot.slane %v822_v50, %v2192_v46  ;;  %v830_v55 = vcombine.high %v822_v50, %v1838_v6  ;;  %v829_v57 = vrot.slane %v815_v54, %v2190_v45 }
 0x27b   : > { %v2198_v51 = vrot.slane %v773_v49, %v2192_v46  ;;  %v781_v60 = vcombine.high %v773_v49, %v1838_v6  ;;  %v780_v62 = vrot.slane %v766_v59, %v2190_v45 }
 0x27c   : > { %v860_v56 = vcombine.high %v837_v53, %v1838_v6  ;;  %v844_v58 = vrot.slane %v830_v55, %v2192_v46  ;;  %v852_v61 = vrot.slane %v829_v57, %v2192_v46  ;;  %v845_v9 = vcombine.high %v829_v57, %v1838_v6 }
 0x27d   : > { %974 = vrot.lane.b32.xlu0 %v1444_v47, %s1841_s18  ;;  %v811_v52 = vcombine.high %v2198_v51, %v1838_v6  ;;  %v795_v63 = vrot.slane %v781_v60, %v2192_v46  ;;  %v803_v0 = vrot.slane %v780_v62, %v2192_v46  ;;  %v796_v4 = vcombine.high %v780_v62, %v1838_v6 }
 0x27e   : > { %v861_v1 = vcombine.high %v844_v58, %v1838_v6  ;;  %v862_v2 = vcombine.high %v852_v61, %v1838_v6  ;;  %v859_v10 = vrot.slane %v845_v9, %v2192_v46 }
 0x27f   : > { %865 = vrot.lane.b32.xlu1 %v811_v52, %s1842_s3  ;;  %v812_v3 = vcombine.high %v795_v63, %v1838_v6  ;;  %v813_v5 = vcombine.high %v803_v0, %v1838_v6  ;;  %v810_v7 = vrot.slane %v796_v4, %v2192_v46 }
 0x280   : > { %v863_v11 = vcombine.high %v859_v10, %v1838_v6 }
 0x281   : > { %893 = vrot.lane.b32.xlu0 %v837_v53, %s1843_s30  ;;  %v814_v8 = vcombine.high %v810_v7, %v1838_v6 }
 0x285   : > { %897 = vrot.lane.b32.xlu0 %v860_v56, %s1844_s28 }
 0x289   : > { %901 = vrot.lane.b32.xlu0 %v844_v58, %s1845_s9 }
 0x28d   : > { %909 = vrot.lane.b32.xlu0 %v852_v61, %s1846_s26 }
 0x291   : > { %869 = vrot.lane.b32.xlu0 %v795_v63, %s1847_s29 }
 0x295   : > { %877 = vrot.lane.b32.xlu0 %v803_v0, %s1848_s23 }
 0x299   : > { %905 = vrot.lane.b32.xlu0 %v861_v1, %s1849_s0 }
 0x29d   : > { %913 = vrot.lane.b32.xlu0 %v862_v2, %s1850_s5  ;;  %v953_v2 = vstv %s2287_s25 }
 0x2a1   : > { %873 = vrot.lane.b32.xlu0 %v812_v3, %s1851_s21 }
 0x2a5   : > { %881 = vrot.lane.b32.xlu0 %v813_v5, %s1852_s12 }
 0x2a9   : > { %885 = vrot.lane.b32.xlu0 %v810_v7, %s1853_s19 }
 0x2ad   : > { %889 = vrot.lane.b32.xlu0 %v814_v8, %s1854_s27 }
 0x2b1   : > { %917 = vrot.lane.b32.xlu0 %v859_v10, %s1855_s11 }
 0x2b5   : > { %921 = vrot.lane.b32.xlu0 %v863_v11, %s1841_s18 }
 0x2eb   : > { %v973_v12 = vpop.permute.xlu0 %972 }
 0x2ec   : > { %v985_v21 = vrot.slane %v973_v12, %v2190_v45  ;;  %v978_v28 = vcombine.high %v973_v12, %v1838_v6 }
 0x2ee   : > { %v2256_v25 = vrot.slane %v985_v21, %v2192_v46  ;;  %v993_v29 = vcombine.high %v985_v21, %v1838_v6  ;;  %v992_v32 = vrot.slane %v978_v28, %v2190_v45 }
 0x2ef   : > { %v975_v13 = vpop.permute.xlu0 %974 }
 0x2f0   : > { %v1034_v14 = vrot.slane %v975_v13, %v2190_v45  ;;  %v1027_v17 = vcombine.high %v975_v13, %v1838_v6  ;;  %v1023_v30 = vcombine.high %v2256_v25, %v1838_v6  ;;  %v1007_v33 = vrot.slane %v993_v29, %v2192_v46 }
 0x2f1   : > { %v1015_v35 = vrot.slane %v992_v32, %v2192_v46  ;;  %v866_v41 = vpop.permute.xlu1 %865  ;;  %v1008_v47 = vcombine.high %v992_v32, %v1838_v6 }
 0x2f2   : > { %v1049_v15 = vrot.slane %v1034_v14, %v2192_v46  ;;  %v1042_v18 = vcombine.high %v1034_v14, %v1838_v6  ;;  %v1041_v22 = vrot.slane %v1027_v17, %v2190_v45  ;;  %v1024_v42 = vcombine.high %v1007_v33, %v1838_v6 }
 0x2f3   : > { %v2242_v16 = vpop.permute.xlu0 %893  ;;  %v925_v44 = vsel %vm924_vm4, %v2198_v51, %v866_v41  ;;  %v1025_v49 = vcombine.high %v1015_v35, %v1838_v6  ;;  %v1022_v53 = vrot.slane %v1008_v47, %v2192_v46 }
 0x2f4   : > { %1105 = vrot.lane.b32.xlu1 %v1049_v15, %s1843_s30  ;;  %v1072_v19 = vcombine.high %v1049_v15, %v1838_v6  ;;  %v1056_v23 = vrot.slane %v1042_v18, %v2192_v46  ;;  %v1064_v26 = vrot.slane %v1041_v22, %v2192_v46  ;;  %v1057_v58 = vcombine.high %v1041_v22, %v1838_v6 }
 0x2f5   : > { %v1026_v60 = vcombine.high %v1022_v53, %v1838_v6 }
 0x2f6   : > { %v1073_v37 = vcombine.high %v1056_v23, %v1838_v6  ;;  %v1074_v39 = vcombine.high %v1064_v26, %v1838_v6  ;;  %v1071_v3 = vrot.slane %v1057_v58, %v2192_v46 }
 0x2f7   : > { %v2248_v20 = vpop.permute.xlu0 %897 }
 0x2f8   : > { %1109 = vrot.lane.b32.xlu1 %v1072_v19, %s1844_s28  ;;  %s482_s28 = scalar_lea.vmem %s2421_s2, %s481_s8  ;;  %v1075_v10 = vcombine.high %v1071_v3, %v1838_v6 }
 0x2f9   : > { %v765_v8 = vld [vmem:[%s482_s28] sm:$0x1] }
 0x2fb   : > { %v902_v24 = vpop.permute.xlu0 %901 }
 0x2fc   : > { %1113 = vrot.lane.b32.xlu1 %v1056_v23, %s1845_s9  ;;  %s2316_s9 = scalar_lea.vmem [#allocation13], %s1382_s13 }
 0x2ff   : > { %v910_v27 = vpop.permute.xlu0 %909 }
 0x300   : > { %1121 = vrot.lane.b32.xlu1 %v1064_v26, %s1846_s26  ;;  %s1396_s26 = sshll.u32 %s1934_s17, 5 }
 0x303   : > { %v870_v31 = vpop.permute.xlu0 %869 }
 0x304   : > { %1077 = vrot.lane.b32.xlu1 %v1023_v30, %s1842_s3  ;;  %v927_v45 = vsel %vm926_vm5, %v925_v44, %v870_v31 }
 0x307   : > { %v878_v34 = vpop.permute.xlu0 %877 }
 0x308   : > { %1081 = vrot.lane.b32.xlu1 %v1007_v33, %s1847_s29 }
 0x30b   : > { %v906_v36 = vpop.permute.xlu0 %905 }
 0x30c   : > { %1089 = vrot.lane.b32.xlu1 %v1015_v35, %s1848_s23 }
 0x30f   : > { %v914_v38 = vpop.permute.xlu0 %913 }
 0x310   : > { %1117 = vrot.lane.b32.xlu1 %v1073_v37, %s1849_s0  ;;  %s2347_s0 = scalar_lea.hbm %s2429_s10, %s1396_s26 }
 0x313   : > { %v874_v40 = vpop.permute.xlu0 %873 }
 0x314   : > { %1125 = vrot.lane.b32.xlu1 %v1074_v39, %s1850_s5  ;;  %v929_v48 = vsel %vm928_vm6, %v927_v45, %v874_v40  ;;  %s1200_s5 = sshll.u32 %s2316_s9, 4  ;;  %s1201_s5 = int_to_ptr.vmem [resolvable:$true] %s1200_s5 }
 0x315   : > { %v930_v52 = vsel %vm497_vm1, %v929_v48, %v878_v34 }
 0x317   : > { %v882_v43 = vpop.permute.xlu0 %881 }
 0x318   : > { %1085 = vrot.lane.b32.xlu1 %v1024_v42, %s1851_s21  ;;  %v932_v51 = vsel %vm931_vm7, %v930_v52, %v882_v43  ;;  %s1174_s21 = scalar_lea.sflag [#allocation14], %s2140_s24 }
 0x31b   : > { %v886_v50 = vpop.permute.xlu0 %885 }
 0x31c   : > { %1093 = vrot.lane.b32.xlu1 %v1025_v49, %s1852_s12  ;;  %v934_v54 = vsel %vm933_vm8, %v932_v51, %v886_v50  ;;  %s1713_s12 = scalar_lea.vmem %s1201_s5, 32 }
 0x31d   : > { %p1714_p1 = scmp.ne.s32.totalorder %s1201_s5, %s1713_s12 }
 0x31f   : > { %v890_v55 = vpop.permute.xlu0 %889  ;;  %p1715_p3 = pnand %p1714_p1, %p2468_p4 }
 0x320   : > { %v936_v56 = vsel %vm935_vm9, %v934_v54, %v890_v55  ;;  %1097 = vrot.lane.b32.xlu1 %v1022_v53, %s1853_s19  ;;  %s1856_s19 = smov [#allocation13]  }
 0x321   : > { %v938_v57 = vsel %vm937_vm10, %v936_v56, %v2242_v16  ;;  %p1716_p2 = pneg %p1715_p3 }
 0x322   : > { %v940_v59 = vsel %vm939_vm11, %v938_v57, %v2248_v20 }
 0x323   : > { %v942_v61 = vsel %vm941_vm12, %v940_v59, %v902_v24  ;;  %v918_v62 = vpop.permute.xlu0 %917 }
 0x324   : > { %v944_v63 = vsel %vm943_vm13, %v942_v61, %v906_v36  ;;  %1101 = vrot.lane.b32.xlu1 %v1026_v60, %s1854_s27  ;;  %s1717_s27 = sshll.u32 %s1856_s19, 4  ;;  %s1718_s27 = int_to_ptr.vmem [resolvable:$false] %s1717_s27 }
 0x325   : > { %v945_v0 = vsel %vm677_vm2, %v944_v63, %v910_v27  ;;  %p1720_p6 = scmp.lt.s32.totalorder %s1201_s5, %s1718_s27 }
 0x326   : > { %v947_v1 = vsel %vm946_vm14, %v945_v0, %v914_v38 }
 0x327   : > { %v949_v4 = vsel %vm948_vm15, %v947_v1, %v918_v62  ;;  %v922_v5 = vpop.permute.xlu0 %921 }
 0x328   : > { %v951_v7 = vsel %vm950_vm0, %v949_v4, %v922_v5  ;;  %1129 = vrot.lane.b32.xlu1 %v1071_v3, %s1855_s11  ;;  %s1719_s11 = scalar_lea.vmem %s1718_s27, 64 }
 0x329   : > { %v954_v9 = vadd.f32 %v953_v2, %v951_v7  ;;  %p1721_p12 = scmp.lt.s32.totalorder %s1719_s11, %s1713_s12 }
 0x32b   : > { %955 = vst [vmem:[%s2316_s9] sm:$0x1] %v954_v9  ;;  %v956_v11 = vadd.f32 %v954_v9, %v765_v8  ;;  %p1722_p8 = por %p1721_p12, %p1720_p6 }
 0x32c   : > { %1133 = vrot.lane.b32.xlu1 %v1075_v10, %s1841_s18  ;;  %s1393_s18 = sld [smem:[#allocation11 + $0x1]] }
 0x32d   : > { %v958_v46 = vsel %vm957_vm3, %v956_v11, -inf  ;;  %p1723_p11 = pnand %p1722_p8, %p1716_p2 }
 0x32e   : > { %959 = vmax.xlane.f32.xlu0 %v958_v46 }
 0x332   : > { %v1152_v38 = vstv %s1393_s18 }
 0x366   : > { %v1106_v12 = vpop.permute.xlu1 %1105 }
 0x36a   : > { %v1110_v13 = vpop.permute.xlu1 %1109 }
 0x36e   : > { %v1114_v14 = vpop.permute.xlu1 %1113 }
 0x372   : > { %v1122_v15 = vpop.permute.xlu1 %1121 }
 0x376   : > { %v1078_v16 = vpop.permute.xlu1 %1077 }
 0x377   : > { %v1136_v22 = vsel %vm924_vm4, %v2256_v25, %v1078_v16 }
 0x37a   : > { %v1082_v17 = vpop.permute.xlu1 %1081 }
 0x37b   : > { %v1137_v23 = vsel %vm926_vm5, %v1136_v22, %v1082_v17 }
 0x37e   : > { %v1090_v18 = vpop.permute.xlu1 %1089 }
 0x382   : > { %v1118_v6 = vpop.permute.xlu1 %1117 }
 0x386   : > { %v1126_v19 = vpop.permute.xlu1 %1125 }
 0x38a   : > { %v1086_v20 = vpop.permute.xlu1 %1085 }
 0x38b   : > { %v1138_v24 = vsel %vm928_vm6, %v1137_v23, %v1086_v20 }
 0x38c   : > { %v1139_v27 = vsel %vm497_vm1, %v1138_v24, %v1090_v18 }
 0x38e   : > { %v1094_v21 = vpop.permute.xlu1 %1093 }
 0x38f   : > { %v1140_v28 = vsel %vm931_vm7, %v1139_v27, %v1094_v21 }
 0x392   : > { %v1098_v26 = vpop.permute.xlu1 %1097 }
 0x393   : > { %v1141_v29 = vsel %vm933_vm8, %v1140_v28, %v1098_v26 }
 0x396   : > { %v1102_v30 = vpop.permute.xlu1 %1101 }
 0x397   : > { %v1142_v31 = vsel %vm935_vm9, %v1141_v29, %v1102_v30 }
 0x398   : > { %v1143_v32 = vsel %vm937_vm10, %v1142_v31, %v1106_v12 }
 0x399   : > { %v1144_v25 = vsel %vm939_vm11, %v1143_v32, %v1110_v13 }
 0x39a   : > { %v1145_v33 = vsel %vm941_vm12, %v1144_v25, %v1114_v14  ;;  %v1130_v34 = vpop.permute.xlu1 %1129 }
 0x39b   : > { %v1146_v35 = vsel %vm943_vm13, %v1145_v33, %v1118_v6 }
 0x39c   : > { %v1147_v36 = vsel %vm677_vm2, %v1146_v35, %v1122_v15 }
 0x39d   : > { %v1148_v37 = vsel %vm946_vm14, %v1147_v36, %v1126_v19 }
 0x39e   : > { %v1149_v39 = vsel %vm948_vm15, %v1148_v37, %v1130_v34  ;;  %v1134_v40 = vpop.permute.xlu1 %1133 }
 0x39f   : > { %v1150_v41 = vsel %vm950_vm0, %v1149_v39, %v1134_v40 }
 0x3a0   : > { %v1153_v42 = vadd.f32 %v1152_v38, %v1150_v41 }
 0x3a2   : > { %1154 = vst [vmem:[%s2316_s9 + $0x1] sm:$0x1] %v1153_v42  ;;  %v1155_v43 = vadd.f32 %v1153_v42, %v765_v8 }
 0x3a4   : > { %v1156_v44 = vsel %vm957_vm3, %v1155_v43, -inf }
 0x3a5   : > { %1157 = vmax.xlane.f32.xlu1 %v1156_v44 }
 0x3bb   : > { %v960_v45 = vpop.xlane.xlu0 %959 }
 0x3bc   : > { %v961_v47 = vsub.f32 %v956_v11, %v960_v45 }
 0x3be   : > { %v962_v48 = vmul.f32 1.442695, %v961_v47 }
 0x3c0   : > { %1574 = vpow2.f32 %v962_v48 }
 0x3ca   : > { %v1575_v49 = vpop.eup %1574 }
 0x3cb   : > { %v964_v50 = vsel %vm957_vm3, %v1575_v49, 0.0 }
 0x3cc   : > { %965 = vadd.xlane.f32.xlu0 %v964_v50 }
 0x432   : > { %v1158_v52 = vpop.xlane.xlu1 %1157 }
 0x433   : > { %v1159_v51 = vsub.f32 %v1155_v43, %v1158_v52 }
 0x435   : > { %v1160_v53 = vmul.f32 1.442695, %v1159_v51 }
 0x437   : > { %1576 = vpow2.f32 %v1160_v53 }
 0x441   : > { %v1577_v54 = vpop.eup %1576 }
 0x442   : > { %v1162_v55 = vsel %vm957_vm3, %v1577_v54, 0.0 }
 0x443   : > { %1163 = vadd.xlane.f32.xlu0 %v1162_v55 }
 0x459   : > { %v966_v56 = vpop.xlane.xlu0 %965 }
 0x45a   : > { %1578 = vrcp.f32 %v966_v56 }
 0x45b   : > { %1726 = shalt.err (!%p1723_p11)
}
 0x45c   : > { %s1727_s25 = scalar_lea.hbm %s2347_s0, 32  ;;  %s1731_s30 = scalar_lea.hbm %s2429_s10, 64 }
 0x45d   : > { %p1728_p7 = scmp.ne.s32.totalorder %s2347_s0, %s1727_s25  ;;  %p1732_p9 = scmp.lt.u32.totalorder %s2347_s0, %s2429_s10 }
 0x45e   : > { %p1733_p13 = scmp.lt.u32.totalorder %s1731_s30, %s1727_s25  ;;  %p1735_p1 = scmp.lt.u32.totalorder %s1727_s25, %s2347_s0 }
 0x45f   : > { %p1729_p10 = pnand %p1728_p7, %p2468_p4 }
 0x460   : > { %p1734_p0 = por %p1733_p13, %p1732_p9 }
 0x461   : > { %p1730_p5 = pneg %p1729_p10 }
 0x462   : > { %p1736_p3 = por %p1735_p1, %p1734_p0 }
 0x464   : > { %p1737_p2 = pnand %p1736_p3, %p1730_p5 }
 0x466   : > { %1740 = shalt.err (!%p1737_p2)
}
 0x467   : > { %1482 = dma.vmem_to_hbm [thread:$0]  (%p2468_p4), %s1201_s5, 32, %s2347_s0, %s1174_s21   ;;  %v1579_v57 = vpop.eup %1578 }
 0x468   : > { %v968_v58 = vmul.f32 %v1579_v57, %v1575_v49  ;;  %s472_s18 = scalar_lea.vmem [#allocation12], %s1382_s13  ;;  %s2469_s19 = sld [smem:[#allocation29_spill]] }
 0x469   : > { %s1187_s29 = sshll.u32 %s472_s18, 4  ;;  %s1169_s0 = scalar_lea.sflag [#allocation4], %s2140_s24  ;;  %s2377_s29 = int_to_ptr.vmem [resolvable:$true] %s1187_s29 }
 0x46a   : > { %969 = vst [vmem:[%s472_s18] sm:$0x1] %v968_v58  ;;  %s1741_s13 = scalar_lea.vmem %s2377_s29, 32  ;;  %s1857_s5 = smov [#allocation12]  }
 0x46b   : > { %p1742_p6 = scmp.ne.s32.totalorder %s2377_s29, %s1741_s13  ;;  %s1745_s21 = sshll.u32 %s1857_s5, 4  ;;  %s1746_s21 = int_to_ptr.vmem [resolvable:$false] %s1745_s21 }
 0x46c   : > { %s1747_s17 = scalar_lea.vmem %s1746_s21, 64  ;;  %p1748_p11 = scmp.lt.s32.totalorder %s2377_s29, %s1746_s21 }
 0x46d   : > { %p1743_p12 = pnand %p1742_p6, %p2468_p4  ;;  %p1749_p7 = scmp.lt.s32.totalorder %s1747_s17, %s1741_s13 }
 0x46e   : > { %s2375_s27 = scalar_lea.hbm %s2469_s19, %s1396_s26 }
 0x46f   : > { %p1744_p8 = pneg %p1743_p12  ;;  %p1750_p10 = por %p1749_p7, %p1748_p11 }
 0x471   : > { %p1751_p5 = pnand %p1750_p10, %p1744_p8 }
 0x4d0   : > { %v1164_v59 = vpop.xlane.xlu0 %1163 }
 0x4d1   : > { %1580 = vrcp.f32 %v1164_v59 }
 0x4db   : > { %v1581_v60 = vpop.eup %1580 }
 0x4dc   : > { %v1166_v61 = vmul.f32 %v1581_v60, %v1577_v54 }
 0x4de   : > { %1167 = vst [vmem:[%s472_s18 + $0x1] sm:$0x1] %v1166_v61 }
 0x4df   : > { %1754 = shalt.err (!%p1751_p5)
}
 0x4e0   : > { %s1755_s24 = scalar_lea.hbm %s2375_s27, 32  ;;  %s1759_s25 = scalar_lea.hbm %s2469_s19, 64 }
 0x4e1   : > { %p1756_p9 = scmp.ne.s32.totalorder %s2375_s27, %s1755_s24  ;;  %p1760_p1 = scmp.lt.u32.totalorder %s2375_s27, %s2469_s19 }
 0x4e2   : > { %p1761_p3 = scmp.lt.u32.totalorder %s1759_s25, %s1755_s24  ;;  %p1763_p6 = scmp.lt.u32.totalorder %s1755_s24, %s2375_s27 }
 0x4e3   : > { %p1757_p13 = pnand %p1756_p9, %p2468_p4 }
 0x4e4   : > { %p1762_p2 = por %p1761_p3, %p1760_p1 }
 0x4e5   : > { %p1758_p0 = pneg %p1757_p13 }
 0x4e6   : > { %p1764_p12 = por %p1763_p6, %p1762_p2 }
 0x4e8   : > { %p1765_p8 = pnand %p1764_p12, %p1758_p0 }
 0x4ea   : > { %1768 = shalt.err (!%p1765_p8)
}
 0x4eb   : > { %1481 = dma.vmem_to_hbm [thread:$0]  (%p2468_p4), %s2377_s29, 32, %s2375_s27, %s1169_s0  }
 0x4ec PF: > { %s2470_s30 = sld [smem:[#allocation22_spill]]  ;;  %s2471_s28 = sld [smem:[#allocation23_spill]] }
 0x4ed   : > { %p2473_p7 = scmp.ge.s32.totalorder %s1827_s16, 2 }
 0x4f2   : > { %s1212_s9 = sand.u32 1, %s2470_s30   ;;  %p2472_p11 = scmp.ne.s32.totalorder %s2471_s28, 0 }
 0x4f3   : > { %s1213_s18 = scalar_lea.sflag [#allocation4], %s1212_s9 }
 0x4f4   : > { %p1503_p10 = pnand %p2473_p7, %p2472_p11 }
 0x4f6   : > { %1806 = dma.done.wait (!%p1503_p10), %s1213_s18, 32  }
 0x4f7   : > { %1808 = vsyncadd (!%p1503_p10), %s1213_s18, 4294967264  ;;  %s1222_s23 = scalar_lea.sflag [#allocation14], %s1212_s9 }
 0x4f8   : > { %1810 = dma.done.wait (!%p1503_p10), %s1222_s23, 32  }
 0x4f9   : > { %1812 = vsyncadd (!%p1503_p10), %s1222_s23, 4294967264  ;;  %s2474_s22 = sld [smem:[#allocation24_spill]]  ;;  %p32_p4 = scmp.ge.s32.totalorder %s2043_s20, 4  }
 0x4fa   : > { %s2475_s13 = smov %s1819_s14  ;;  %s2476_s14 = smov %s1823_s15 }
 0x4fb   : > { %s2478_s16 = smov %s2043_s20  ;;  %34 = sbr.rel (!%p32_p4) target bundleno = 17 (0x11), region = 147 }
 0x4ff   : > { %s2477_s15 = smov %s2474_s22 }
 0x502   :  { %1227 = vsyncpa [#allocation3], 1 }
 0x503   :  { %1229 = vsyncpa [#allocation3 + $0x1], 1 }
 0x504   :  { %1230 = vsyncpa [#allocation7], 1 }
 0x505   :  { %1232 = vsyncpa [#allocation7 + $0x1], 1 }
 0x506   :  { %1233 = vsyncpa [#allocation10], 1 }
 0x507   :  { %1234 = vsyncpa [#allocation4], 1 }
 0x508   :  { %1236 = vsyncpa [#allocation4 + $0x1], 1 }
 0x509   :  { %1237 = vsyncpa [#allocation14], 1 }
 0x50a   :  { %1239 = vsyncpa [#allocation14 + $0x1], 1 }
 0x50b   :  { %1240 = vsyncpa [#allocation5], 1 }
 0x50c   :  { %1242 = vsyncpa [#allocation5 + $0x1], 1 }

</bundles_post_ra>
